<compile_context>
chip_gen: v7x
topology: tpu7x:2x2x1
jax: 0.10.0
libtpu: 0.0.40
codegen_flags: <defaults>
</compile_context>

<pallas_src>
import jax
import jax.numpy as jnp
from jax.experimental import pallas as pl
from jax.experimental.pallas import tpu as pltpu


def _hard_relu_kernel(x_ref, o_ref):
    x = x_ref[...]
    # heaviside(x, 0): 1 for x > 0, 0 for x <= 0 (including x == 0).
    h = (x > 0).astype(o_ref.dtype)
    if jnp.issubdtype(x_ref.dtype, jnp.floating):
        # torch.heaviside propagates NaN; (NaN > 0) is False so fix it up.
        h = jnp.where(jnp.isnan(x), x, h)
    o_ref[...] = h


def _default_tile_bytes() -> int:
    """Per-buffer tile bytes tuned per TPU generation (HBM-roofline driven)."""
    try:
        kind = jax.devices()[0].device_kind.lower()
    except Exception:
        return 4 * 1024 * 1024
    if "v5" in kind and ("lite" in kind or "5e" in kind):
        return 2 * 1024 * 1024   # v5e: 16 MiB default scoped VMEM, ~0.82 TB/s
    if "v6" in kind:
        return 4 * 1024 * 1024   # v6e: ~1.4 TB/s
    if "v7" in kind:
        return 8 * 1024 * 1024   # v7x: ~3.2 TB/s per TC
    return 4 * 1024 * 1024


_LANE_CANDIDATES = (1024, 512, 256, 128)


def hard_relu(x: jax.Array,
              *,
              target_tile_bytes: int | None = None,
              donate_input: bool = False) -> jax.Array:
    """Elementwise heaviside(x, 0) implemented in Pallas (lane-dense tiling)."""
    orig_shape = x.shape
    dtype = x.dtype
    size = x.size
    if size == 0:
        return x
    itemsize = jnp.dtype(dtype).itemsize
    if target_tile_bytes is None:
        target_tile_bytes = _default_tile_bytes()

    # Pick the widest lane count that divides the flat size exactly -> the
    # reshape to (rows, lanes) is zero-copy and no pad/slice HBM passes occur.
    lanes = None
    for cand in _LANE_CANDIDATES:
        if size % cand == 0:
            lanes = cand
            break

    flat = x.reshape(-1)
    if lanes is None:
        # Rare fallback: pad at most 127 elements at lanes=128.
        lanes = 128
        padded_size = pl.cdiv(size, lanes) * lanes
        flat = jnp.pad(flat, (0, padded_size - size))
    else:
        padded_size = size

    rows = padded_size // lanes
    x2d = flat.reshape(rows, lanes)

    # dtype-aware sublane multiple: 8 (32-bit), 16 (bf16/fp16), 32 (int8/fp8).
    sub = max(8, 32 // itemsize)
    bytes_per_row = lanes * itemsize

    if rows <= sub:
        block_rows = rows  # full extent along sublane axis (allowed)
    else:
        block_rows = min(rows, max(sub, target_tile_bytes // bytes_per_row))
        block_rows = max(sub, (block_rows // sub) * sub)
        # Keep >= 2 "parallel" grid steps so both v7x TensorCores are used.
        if rows >= 2 * sub:
            half_rows = pl.cdiv(pl.cdiv(rows, 2), sub) * sub
            block_rows = min(block_rows, half_rows)

    num_blocks = pl.cdiv(rows, block_rows)

    # Scoped VMEM: in + out, double-buffered, plus headroom; cap below physical.
    block_bytes = block_rows * lanes * itemsize
    vmem_limit = min(64 << 20, max(16 << 20, 4 * block_bytes + (8 << 20)))

    out2d = pl.pallas_call(
        _hard_relu_kernel,
        out_shape=jax.ShapeDtypeStruct((rows, lanes), dtype),
        grid=(num_blocks,),
        in_specs=[pl.BlockSpec((block_rows, lanes), lambda i: (i, 0))],
        out_specs=pl.BlockSpec((block_rows, lanes), lambda i: (i, 0)),
        compiler_params=pltpu.CompilerParams(
            dimension_semantics=("parallel",),
            vmem_limit_bytes=vmem_limit,
        ),
        input_output_aliases={0: 0} if donate_input else {},
    )(x2d)

    out_flat = out2d.reshape(-1)
    if padded_size != size:
        out_flat = out_flat[:size]
    return out_flat.reshape(orig_shape)


def _ref_heaviside0(x: jax.Array) -> jax.Array:
    h = (x > 0).astype(x.dtype)
    if jnp.issubdtype(x.dtype, jnp.floating):
        h = jnp.where(jnp.isnan(x), x, h)
    return h


# TODO(synk): HardReLU_F.backward (custom zero-gradient backward) is autograd-
# only and not part of the forward pass, so it is not implemented here.

if __name__ == "__main__":
    key = jax.random.PRNGKey(0)
    # Small NCHW-shaped input consistent with typical conv-activation usage.
    x = jax.random.normal(key, (2, 4, 16, 16), dtype=jnp.float32)
    # Exercise x == 0, negatives, and NaN passthrough.
    x = x.at[0, 0, 0, :5].set(
        jnp.array([0.0, -1.0, 2.0, -0.0, jnp.nan], jnp.float32))

    out = jax.block_until_ready(hard_relu(x))
    ref = _ref_heaviside0(x)
    assert out.shape == x.shape
    assert out.dtype == x.dtype
    assert bool(jnp.allclose(out, ref, equal_nan=True))

    # Non-divisible size: exercises the (rare) pad fallback + ragged grid.
    x_big = jax.random.normal(jax.random.PRNGKey(1), (3, 5, 33, 47), jnp.float32)
    out_big = jax.block_until_ready(hard_relu(x_big))
    assert bool(jnp.allclose(out_big, _ref_heaviside0(x_big), equal_nan=True))

    # bf16 path: exercises dtype-aware sublane rounding (packed dtype).
    x_bf = jax.random.normal(jax.random.PRNGKey(2), (2, 4, 16, 16), jnp.bfloat16)
    out_bf = jax.block_until_ready(hard_relu(x_bf))
    assert out_bf.dtype == jnp.bfloat16
    assert bool(jnp.allclose(out_bf.astype(jnp.float32),
                             _ref_heaviside0(x_bf).astype(jnp.float32),
                             equal_nan=True))

    print("KERNEL_OK")
</pallas_src>

<mosaic_0001>
module attributes {stable_mosaic.version = 11 : i64} {
  func.func @_hard_relu_kernel(%arg0: i32, %arg1: memref<2x1024xf32, #tpu.memory_space<vmem>>, %arg2: memref<2x1024xf32, #tpu.memory_space<vmem>>) attributes {dimension_semantics = [#tpu.dimension_semantics<parallel>], iteration_bounds = array<i64: 1>, scalar_prefetch = 0 : i64, scratch_operands = 0 : i64, tpu.core_type = #tpu.core_type<tc>, window_params = [{transform_indices = @transform_0, window_bounds = array<i64: 2, 1024>}, {transform_indices = @transform_1, window_bounds = array<i64: 2, 1024>}]} {
    %c0 = arith.constant 0 : index
    %c0_0 = arith.constant 0 : index
    %0 = vector.load %arg1[%c0, %c0_0] : memref<2x1024xf32, #tpu.memory_space<vmem>>, vector<2x1024xf32>
    %cst = arith.constant 0.000000e+00 : f32
    %1 = vector.broadcast %cst : f32 to vector<2x1024xf32>
    %2 = arith.cmpf ogt, %0, %1 : vector<2x1024xf32>
    %3 = arith.extui %2 : vector<2x1024xi1> to vector<2x1024xi32>
    %4 = arith.sitofp %3 : vector<2x1024xi32> to vector<2x1024xf32>
    %5 = arith.cmpf one, %0, %0 : vector<2x1024xf32>
    %6 = arith.select %5, %0, %4 : vector<2x1024xi1>, vector<2x1024xf32>
    %c0_1 = arith.constant 0 : index
    %c0_2 = arith.constant 0 : index
    %7 = vector.load %arg2[%c0_1, %c0_2] : memref<2x1024xf32, #tpu.memory_space<vmem>>, vector<2x1024xf32>
    tpu.vector_store %arg2[%c0_1, %c0_2], %6 {strides = array<i32>} : memref<2x1024xf32, #tpu.memory_space<vmem>>, vector<2x1024xf32>,
    return
  }
  func.func @transform_0(%arg0: i32) -> (i32, i32) {
    %c0_i32 = arith.constant 0 : i32
    %c0_i32_0 = arith.constant 0 : i32
    return %arg0, %c0_i32 : i32, i32
  }
  func.func @transform_1(%arg0: i32) -> (i32, i32) {
    %c0_i32 = arith.constant 0 : i32
    %c0_i32_0 = arith.constant 0 : i32
    return %arg0, %c0_i32 : i32, i32
  }
}

</mosaic_0001>

<bundles_post_ra>
// kernel: tpu_custom_call.1
= control target key start
LH: loop header
LB: loop body
LE: loop exit
PB: predicated region body
PF: predicated region fallthrough
CT: control target
= control target key end

     0   :  { %6 = vsyncpa [#allocation3], 0  ;;  %s140_s0 = inlined_call_operand.hbm [shape: f32[2,1024], index: 0, kind: input, shape index: {}]   ;;  %s141_s1 = inlined_call_operand.hbm [shape: f32[2,1024], index: 1, kind: output, shape index: {}]  }
   0x1   :  { %7 = vsyncpa [#allocation4], 0  ;;  %s103_s6 = smov [#allocation2]   ;;  %s55_s10 = scalar_lea.hbm %s140_s0, 256 }
   0x2   :  { %s14_s7 = sshll.u32 %s103_s6, 4  ;;  %p56_p0 = scmp.ne.s32.totalorder %s140_s0, %s55_s10  ;;  %s15_s7 = int_to_ptr.vmem [resolvable:$true] %s14_s7 }
   0x3   :  { %p59_p1 = scmp.lt.u32.totalorder %s55_s10, %s140_s0 }
   0x5   :  { %p61_p2 = pnand %p59_p1, %p56_p0 }
   0x7   :  { %64 = shalt.err (!%p61_p2)
}
   0x8   :  { %s65_s15 = scalar_lea.vmem %s15_s7, 256  ;;  %p70_p4 = scmp.lt.s32.totalorder %s15_s7, %s15_s7 }
   0x9   :  { %p66_p3 = scmp.ne.s32.totalorder %s15_s7, %s65_s15  ;;  %p71_p5 = scmp.lt.s32.totalorder %s65_s15, %s65_s15 }
   0xb   :  { %p72_p6 = por %p71_p5, %p70_p4 }
   0xd   :  { %p73_p7 = pnand %p72_p6, %p66_p3 }
   0xf   :  { %76 = shalt.err (!%p73_p7)
}
  0x10   :  { %17 = dma.hbm_to_vmem [thread:$0]  %s140_s0, 256, %s15_s7, [#allocation3]  }
  0x11   :  { %99 = dma.done.wait [#allocation3], 256  }
  0x12   :  { %100 = vsyncadd [#allocation3], 4294967040  ;;  %s104_s18 = smov [#allocation5]   ;;  %v21_v0 = vld [vmem:[#allocation2] sm:$0xff]  ;;  %v22_v1 = vld [vmem:[#allocation2 + $0x8] sm:$0xff]  ;;  %v105_v2 = vmov 0.0  }
  0x13   :  { %s41_s19 = sshll.u32 %s104_s18, 4  ;;  %vm23_vm0 = vcmp.gt.f32.partialorder %v21_v0, 0.0  ;;  %vm29_vm1 = vcmp.ne.f32.partialorder %v21_v0, %v21_v0  ;;  %vm24_vm2 = vcmp.gt.f32.partialorder %v22_v1, 0.0  ;;  %vm30_vm3 = vcmp.ne.f32.partialorder %v22_v1, %v22_v1  ;;  %s42_s19 = int_to_ptr.vmem [resolvable:$true] %s41_s19 }
  0x14   :  { %v50_v3 = vsel %vm23_vm0, 1.0, %v105_v2  ;;  %v51_v4 = vsel %vm24_vm2, 1.0, %v105_v2  ;;  %s77_s20 = scalar_lea.vmem %s42_s19, 256  ;;  %p82_p9 = scmp.lt.s32.totalorder %s42_s19, %s42_s19 }
  0x15   :  { %v31_v5 = vsel %vm29_vm1, %v21_v0, %v50_v3  ;;  %v32_v6 = vsel %vm30_vm3, %v22_v1, %v51_v4  ;;  %p78_p8 = scmp.ne.s32.totalorder %s42_s19, %s77_s20  ;;  %p83_p10 = scmp.lt.s32.totalorder %s77_s20, %s77_s20 }
  0x16   :  { %33 = vst [vmem:[#allocation5] sm:$0xff] %v31_v5  ;;  %34 = vst [vmem:[#allocation5 + $0x8] sm:$0xff] %v32_v6 }
  0x17   :  { %p84_p11 = por %p83_p10, %p82_p9 }
  0x19   :  { %p85_p12 = pnand %p84_p11, %p78_p8 }
  0x1b   :  { %88 = shalt.err (!%p85_p12)
}
  0x1c   :  { %s89_s22 = scalar_lea.hbm %s141_s1, 256 }
  0x1d   :  { %p90_p13 = scmp.ne.s32.totalorder %s141_s1, %s89_s22  ;;  %p93_p0 = scmp.lt.u32.totalorder %s89_s22, %s141_s1 }
  0x1f   :  { %p95_p1 = pnand %p93_p0, %p90_p13 }
  0x21   :  { %98 = shalt.err (!%p95_p1)
}
  0x22   :  { %44 = dma.vmem_to_hbm [thread:$0]  %s42_s19, 256, %s141_s1, [#allocation4]  }
  0x23   :  { %101 = dma.done.wait [#allocation4], 256  }
  0x24   :  { %102 = vsyncadd [#allocation4], 4294967040 }
  0x25   :  { %48 = vsyncpa [#allocation3], 1 }
  0x26   :  { %49 = vsyncpa [#allocation4], 1 }

</bundles_post_ra>
